<compile_context>
chip_gen: v6e
topology: v6e:2x2x1
jax: 0.10.0
libtpu: 0.0.40
codegen_flags: <defaults>
</compile_context>

<pallas_src>
import functools
import math

import jax
import jax.numpy as jnp
from jax.experimental import pallas as pl
from jax.experimental.pallas import tpu as pltpu


def _sample_aware_bce_kernel(x_ref, y_ref, out_ref, *, eps, log_eps, num_classes):
    x = x_ref[...].astype(jnp.float32)          # [TB, C]
    y = y_ref[...].astype(jnp.float32)          # [TB, C]

    # log-sigmoid identity (shared softplus term): 1 exp + 1 log per element.
    sp = jnp.log(1.0 + jnp.exp(-jnp.abs(x)))                    # softplus(-|x|)
    log_p = jnp.maximum(jnp.minimum(x, 0.0) - sp, log_eps)      # log(max(sigmoid(x), eps))
    log_1mp = jnp.maximum(jnp.minimum(-x, 0.0) - sp, log_eps)   # log(max(1-sigmoid(x), eps))

    # Faithful to the PyTorch forward for arbitrary targets (not only 0/1):
    #   loss    = y*log_p + (1-y)*log_1mp
    #   pos_num = sum(y*loss)
    #   neg_num = sum((1-y)*loss) = sum(loss) - sum(y*loss)
    #   n_neg   = sum(1-y)        = C - sum(y)
    # -> only 3 lane (XLU) reductions per row.
    loss = y * log_p + (1.0 - y) * log_1mp                         # [TB, C]
    pos_num = jnp.sum(y * loss, axis=1, keepdims=True)             # [TB, 1]
    sum_loss = jnp.sum(loss, axis=1, keepdims=True)                # [TB, 1]
    n_pos = jnp.sum(y, axis=1, keepdims=True)                      # [TB, 1]

    neg_num = sum_loss - pos_num
    pos_loss = pos_num / (n_pos + eps)
    neg_loss = neg_num / ((num_classes - n_pos) + eps)

    out_ref[...] = -(pos_loss + neg_loss)


def _auto_tile_b(B, C, x_itemsize, y_itemsize, *, vmem_budget_bytes=16 << 20, cap=1024):
    """Largest batch tile whose double-buffered input blocks + in-kernel f32
    temporaries fit a conservative VMEM budget (safe for v7x's 64 MiB VMEM)."""
    # Per tile row: x/y blocks are double-buffered by the pipeline; the
    # element-wise chain materializes ~8 full-width f32 temporaries.
    row_bytes = C * (2 * x_itemsize + 2 * y_itemsize + 8 * 4)
    max_rows = vmem_budget_bytes // max(row_bytes, 1)
    max_rows = min(max((max_rows // 16) * 16, 8), cap)
    # TODO(synk): for very large C (where even 8 rows exceed the budget), add a
    # second "arbitrary" grid axis over C with per-row VMEM accumulators
    # instead of loading a full-C row per step.
    if B > max_rows:
        return max_rows
    # Whole batch fits in one block: split into two grid steps when big enough
    # so both v7x TensorCores get work (also enables DMA/compute overlap;
    # harmless on single-TC v5e/v6e).
    if B >= 32:
        half = (((B + 1) // 2) + 15) // 16 * 16
        if half < B:
            return half
    return B


def sample_aware_bce(x, y, *, eps=1e-8, reduce="mean", tile_b=None):
    """x: [B, C] logits, y: [B, C] multi-label (binarized or soft) targets.

    y may be passed as bf16/int for less HBM traffic; it is cast to f32 in-kernel.
    """
    B, C = x.shape
    assert y.shape == (B, C)
    if tile_b is None:
        tile_b = _auto_tile_b(B, C, x.dtype.itemsize, y.dtype.itemsize)
    grid = (pl.cdiv(B, tile_b),)

    kernel = functools.partial(
        _sample_aware_bce_kernel,
        eps=float(eps),
        log_eps=float(math.log(eps)),
        num_classes=float(C),
    )

    per_sample = pl.pallas_call(
        kernel,
        out_shape=jax.ShapeDtypeStruct((B, 1), jnp.float32),
        grid_spec=pltpu.PrefetchScalarGridSpec(
            num_scalar_prefetch=0,
            grid=grid,
            in_specs=[
                pl.BlockSpec((tile_b, C), lambda i: (i, 0)),
                pl.BlockSpec((tile_b, C), lambda i: (i, 0)),
            ],
            out_specs=pl.BlockSpec((tile_b, 1), lambda i: (i, 0)),
        ),
        compiler_params=pltpu.CompilerParams(
            dimension_semantics=("parallel",),
            vmem_limit_bytes=48 * 1024 * 1024,
        ),
    )(x, y)

    neg_loss = per_sample[:, 0]  # [B], already negated (== -self.loss)
    if reduce == "mean":
        return jnp.mean(neg_loss)
    elif reduce == "sum":
        return jnp.sum(neg_loss)
    elif reduce == "none":
        return neg_loss
    else:
        raise NotImplementedError(reduce)


def _reference_per_sample(x, y, eps=1e-8):
    # Pure-JAX reference mirroring the PyTorch forward (sigmoid -> clamp -> log).
    x = x.astype(jnp.float32)
    y = y.astype(jnp.float32)
    anti = 1.0 - y
    xs_pos = jax.nn.sigmoid(x)
    xs_neg = 1.0 - xs_pos
    loss = y * jnp.log(jnp.maximum(xs_pos, eps)) + anti * jnp.log(jnp.maximum(xs_neg, eps))
    pos = jnp.sum(y * loss, axis=1) / (jnp.sum(y, axis=1) + eps)
    neg = jnp.sum(anti * loss, axis=1) / (jnp.sum(anti, axis=1) + eps)
    return -(pos + neg)


if __name__ == "__main__":
    key = jax.random.PRNGKey(0)

    # Case 1: small batch, single grid step.
    k1, k2, k3, k4 = jax.random.split(key, 4)
    B1, C1 = 8, 256
    x1 = jax.random.normal(k1, (B1, C1), dtype=jnp.float32)
    y1 = (jax.random.uniform(k2, (B1, C1)) < 0.1).astype(jnp.float32)
    out1 = jax.block_until_ready(sample_aware_bce(x1, y1))
    ref1 = jnp.mean(_reference_per_sample(x1, y1))
    assert jnp.allclose(out1, ref1, rtol=1e-5, atol=1e-5), (out1, ref1)

    # Case 2: multi-step grid with a partial (masked) last block.
    B2, C2 = 50, 256
    x2 = jax.random.normal(k3, (B2, C2), dtype=jnp.float32)
    y2 = (jax.random.uniform(k4, (B2, C2)) < 0.1).astype(jnp.float32)
    out2 = jax.block_until_ready(sample_aware_bce(x2, y2, reduce="none"))
    ref2 = _reference_per_sample(x2, y2)
    assert jnp.allclose(out2, ref2, rtol=1e-5, atol=1e-5), (out2, ref2)

    print("KERNEL_OK")
</pallas_src>

<mosaic_0001>
module attributes {stable_mosaic.version = 11 : i64} {
  func.func @_sample_aware_bce_kernel(%arg0: i32, %arg1: memref<8x256xf32, #tpu.memory_space<vmem>>, %arg2: memref<8x256xf32, #tpu.memory_space<vmem>>, %arg3: memref<8x1xf32, #tpu.memory_space<vmem>>) attributes {dimension_semantics = [#tpu.dimension_semantics<parallel>], iteration_bounds = array<i64: 1>, scalar_prefetch = 0 : i64, scratch_operands = 0 : i64, tpu.core_type = #tpu.core_type<tc>, window_params = [{transform_indices = @transform_0, window_bounds = array<i64: 8, 256>}, {transform_indices = @transform_1, window_bounds = array<i64: 8, 256>}, {transform_indices = @transform_2, window_bounds = array<i64: 8, 1>}]} {
    %c0 = arith.constant 0 : index
    %c0_0 = arith.constant 0 : index
    %0 = vector.load %arg1[%c0, %c0_0] : memref<8x256xf32, #tpu.memory_space<vmem>>, vector<8x256xf32>
    %c0_1 = arith.constant 0 : index
    %c0_2 = arith.constant 0 : index
    %1 = vector.load %arg2[%c0_1, %c0_2] : memref<8x256xf32, #tpu.memory_space<vmem>>, vector<8x256xf32>
    %2 = math.absf %0 : vector<8x256xf32>
    %cst = arith.constant 0.000000e+00 : f32
    %3 = vector.broadcast %cst : f32 to vector<8x256xf32>
    %4 = arith.subf %3, %2 : vector<8x256xf32>
    %5 = math.exp %4 : vector<8x256xf32>
    %cst_3 = arith.constant 1.000000e+00 : f32
    %6 = vector.broadcast %cst_3 : f32 to vector<8x256xf32>
    %7 = arith.addf %6, %5 : vector<8x256xf32>
    %8 = math.log %7 : vector<8x256xf32>
    %cst_4 = arith.constant 0.000000e+00 : f32
    %9 = vector.broadcast %cst_4 : f32 to vector<8x256xf32>
    %10 = arith.minimumf %0, %9 : vector<8x256xf32>
    %11 = arith.subf %10, %8 : vector<8x256xf32>
    %cst_5 = arith.constant -18.420681 : f32
    %12 = vector.broadcast %cst_5 : f32 to vector<8x256xf32>
    %13 = arith.maximumf %11, %12 : vector<8x256xf32>
    %cst_6 = arith.constant 0.000000e+00 : f32
    %14 = vector.broadcast %cst_6 : f32 to vector<8x256xf32>
    %15 = arith.subf %14, %0 : vector<8x256xf32>
    %cst_7 = arith.constant 0.000000e+00 : f32
    %16 = vector.broadcast %cst_7 : f32 to vector<8x256xf32>
    %17 = arith.minimumf %15, %16 : vector<8x256xf32>
    %18 = arith.subf %17, %8 : vector<8x256xf32>
    %cst_8 = arith.constant -18.420681 : f32
    %19 = vector.broadcast %cst_8 : f32 to vector<8x256xf32>
    %20 = arith.maximumf %18, %19 : vector<8x256xf32>
    %21 = arith.mulf %1, %13 : vector<8x256xf32>
    %cst_9 = arith.constant 1.000000e+00 : f32
    %22 = vector.broadcast %cst_9 : f32 to vector<8x256xf32>
    %23 = arith.subf %22, %1 : vector<8x256xf32>
    %24 = arith.mulf %23, %20 : vector<8x256xf32>
    %25 = arith.addf %21, %24 : vector<8x256xf32>
    %26 = arith.mulf %1, %25 : vector<8x256xf32>
    %cst_10 = arith.constant dense<0.000000e+00> : vector<8xf32>
    %27 = vector.multi_reduction <add>, %26, %cst_10 [1] : vector<8x256xf32> to vector<8xf32>
    %28 = vector.shape_cast %27 : vector<8xf32> to vector<8x1xf32>
    %cst_11 = arith.constant dense<0.000000e+00> : vector<8xf32>
    %29 = vector.multi_reduction <add>, %25, %cst_11 [1] : vector<8x256xf32> to vector<8xf32>
    %30 = vector.shape_cast %29 : vector<8xf32> to vector<8x1xf32>
    %cst_12 = arith.constant dense<0.000000e+00> : vector<8xf32>
    %31 = vector.multi_reduction <add>, %1, %cst_12 [1] : vector<8x256xf32> to vector<8xf32>
    %32 = vector.shape_cast %31 : vector<8xf32> to vector<8x1xf32>
    %33 = arith.subf %30, %28 : vector<8x1xf32>
    %cst_13 = arith.constant 9.99999993E-9 : f32
    %34 = vector.broadcast %cst_13 : f32 to vector<8x1xf32>
    %35 = arith.addf %32, %34 : vector<8x1xf32>
    %36 = arith.divf %28, %35 : vector<8x1xf32>
    %cst_14 = arith.constant 2.560000e+02 : f32
    %37 = vector.broadcast %cst_14 : f32 to vector<8x1xf32>
    %38 = arith.subf %37, %32 : vector<8x1xf32>
    %cst_15 = arith.constant 9.99999993E-9 : f32
    %39 = vector.broadcast %cst_15 : f32 to vector<8x1xf32>
    %40 = arith.addf %38, %39 : vector<8x1xf32>
    %41 = arith.divf %33, %40 : vector<8x1xf32>
    %42 = arith.addf %36, %41 : vector<8x1xf32>
    %cst_16 = arith.constant 0.000000e+00 : f32
    %43 = vector.broadcast %cst_16 : f32 to vector<8x1xf32>
    %44 = arith.subf %43, %42 : vector<8x1xf32>
    %c0_17 = arith.constant 0 : index
    %c0_18 = arith.constant 0 : index
    %45 = vector.load %arg3[%c0_17, %c0_18] : memref<8x1xf32, #tpu.memory_space<vmem>>, vector<8x1xf32>
    tpu.vector_store %arg3[%c0_17, %c0_18], %44 {strides = array<i32>} : memref<8x1xf32, #tpu.memory_space<vmem>>, vector<8x1xf32>,
    return
  }
  func.func @transform_0(%arg0: i32) -> (i32, i32) {
    %c0_i32 = arith.constant 0 : i32
    %c0_i32_0 = arith.constant 0 : i32
    return %arg0, %c0_i32 : i32, i32
  }
  func.func @transform_1(%arg0: i32) -> (i32, i32) {
    %c0_i32 = arith.constant 0 : i32
    %c0_i32_0 = arith.constant 0 : i32
    return %arg0, %c0_i32 : i32, i32
  }
  func.func @transform_2(%arg0: i32) -> (i32, i32) {
    %c0_i32 = arith.constant 0 : i32
    %c0_i32_0 = arith.constant 0 : i32
    return %arg0, %c0_i32 : i32, i32
  }
}

</mosaic_0001>

<bundles_post_ra>
// kernel: tpu_custom_call.1
= control target key start
LH: loop header
LB: loop body
LE: loop exit
PB: predicated region body
PF: predicated region fallthrough
CT: control target
= control target key end

     0   :  { %7 = vsyncpa [#allocation3], 0  ;;  %s188_s0 = inlined_call_operand.hbm [shape: f32[8,256], index: 0, kind: input, shape index: {}]   ;;  %s189_s1 = inlined_call_operand.hbm [shape: f32[8,256], index: 1, kind: input, shape index: {}]   ;;  %s190_s2 = inlined_call_operand.vmem [shape: f32[8,1], index: 2, kind: output, shape index: {}]  }
   0x1   :  { %8 = vsyncpa [#allocation5], 0  ;;  %s162_s9 = smov [#allocation2]   ;;  %s163_s11 = smov [#allocation4]  }
   0x2   :  { %s15_s10 = sshll.u32 %s162_s9, 4  ;;  %s25_s12 = sshll.u32 %s163_s11, 4  ;;  %s16_s10 = int_to_ptr.vmem [resolvable:$true] %s15_s10  ;;  %s26_s12 = int_to_ptr.vmem [resolvable:$true] %s25_s12 }
   0x3   :  { %s126_s13 = scalar_lea.vmem %s16_s10, 256  ;;  %p131_p1 = scmp.lt.s32.totalorder %s16_s10, %s16_s10 }
   0x4   :  { %p127_p0 = scmp.ne.s32.totalorder %s16_s10, %s126_s13  ;;  %p132_p2 = scmp.lt.s32.totalorder %s126_s13, %s126_s13 }
   0x6   :  { %p133_p3 = por %p132_p2, %p131_p1 }
   0x8   :  { %p134_p4 = pnand %p133_p3, %p127_p0 }
   0xa   :  { %137 = shalt.err (!%p134_p4)
}
   0xb   :  { %18 = dma.hbm_to_vmem [thread:$0]  %s188_s0, 256, %s16_s10, [#allocation3]  }
   0xc   :  { %s146_s16 = scalar_lea.vmem %s26_s12, 256  ;;  %p151_p6 = scmp.lt.s32.totalorder %s26_s12, %s26_s12 }
   0xd   :  { %p147_p5 = scmp.ne.s32.totalorder %s26_s12, %s146_s16  ;;  %p152_p7 = scmp.lt.s32.totalorder %s146_s16, %s146_s16 }
   0xf   :  { %p153_p8 = por %p152_p7, %p151_p6 }
  0x11   :  { %p154_p9 = pnand %p153_p8, %p147_p5 }
  0x13   :  { %157 = shalt.err (!%p154_p9)
}
  0x14   :  { %28 = dma.hbm_to_vmem [thread:$0]  %s189_s1, 256, %s26_s12, [#allocation5]  }
  0x15   :  { %158 = dma.done.wait [#allocation3], 256  }
  0x16   :  { %159 = vsyncadd [#allocation3], 4294967040 }
  0x17   :  { %160 = dma.done.wait [#allocation5], 256  }
  0x18   :  { %161 = vsyncadd [#allocation5], 4294967040  ;;  %v37_v0 = vld [vmem:[#allocation4] sm:$0xff]  ;;  %v38_v1 = vld [vmem:[#allocation4 + $0x8] sm:$0xff]  ;;  %vm96_vm0 = vcmask 7168  }
  0x19   :  { %v35_v2 = vld [vmem:[#allocation2] sm:$0xff]  ;;  %v83_v3 = vadd.f32 %v38_v1, %v37_v0  ;;  %v36_v4 = vld [vmem:[#allocation2 + $0x8] sm:$0xff]  ;;  %v69_v27 = vsub.f32 1.0, %v37_v0  ;;  %v70_v30 = vsub.f32 1.0, %v38_v1 }
  0x1a   :  { %v39_v5 = vand.u32 2147483647, %v35_v2  ;;  %v40_v6 = vand.u32 2147483647, %v36_v4  ;;  %v59_v15 = vsub.f32 0.0, %v35_v2  ;;  %v60_v16 = vsub.f32 0.0, %v36_v4 }
  0x1b   :  { %84 = vadd.xlane.f32.xlu0 %v83_v3  ;;  %v53_v17 = vmin.f32 %v35_v2, 0.0  ;;  %v54_v20 = vmin.f32 %v36_v4, 0.0 }
  0x1c   :  { %v41_v7 = vsub.f32 0.0, %v39_v5  ;;  %v42_v8 = vsub.f32 0.0, %v40_v6  ;;  %v61_v18 = vmin.f32 %v59_v15, 0.0  ;;  %v62_v21 = vmin.f32 %v60_v16, 0.0 }
  0x1e   :  { %v43_v9 = vmul.f32 1.442695, %v41_v7  ;;  %v45_v10 = vmul.f32 1.442695, %v42_v8 }
  0x20   :  { %106 = vpow2.f32 %v43_v9 }
  0x21   :  { %108 = vpow2.f32 %v45_v10 }
  0x2d   :  { %v107_v11 = vpop.eup %106 }
  0x2e   :  { %v109_v12 = vpop.eup %108  ;;  %v47_v13 = vadd.f32 1.0, %v107_v11 }
  0x2f   :  { %v48_v14 = vadd.f32 1.0, %v109_v12 }
  0x30   :  { %110 = vlog2.f32 %v47_v13 }
  0x31   :  { %112 = vlog2.f32 %v48_v14 }
  0x3d   :  { %v111_v19 = vpop.eup %110 }
  0x3e   :  { %v113_v22 = vpop.eup %112  ;;  %v50_v23 = vmul.f32 0.6931472, %v111_v19 }
  0x3f   :  { %v52_v24 = vmul.f32 0.6931472, %v113_v22 }
  0x40   :  { %v55_v25 = vsub.f32 %v53_v17, %v50_v23  ;;  %v63_v26 = vsub.f32 %v61_v18, %v50_v23 }
  0x41   :  { %v56_v28 = vsub.f32 %v54_v20, %v52_v24  ;;  %v64_v29 = vsub.f32 %v62_v21, %v52_v24 }
  0x42   :  { %v57_v31 = vmax.f32 %v55_v25, -18.420681  ;;  %v65_v32 = vmax.f32 %v63_v26, -18.420681 }
  0x43   :  { %v58_v33 = vmax.f32 %v56_v28, -18.420681  ;;  %v66_v34 = vmax.f32 %v64_v29, -18.420681 }
  0x44   :  { %v67_v35 = vmul.f32 %v57_v31, %v37_v0  ;;  %v71_v36 = vmul.f32 %v69_v27, %v65_v32 }
  0x45   :  { %v68_v37 = vmul.f32 %v58_v33, %v38_v1  ;;  %v72_v38 = vmul.f32 %v70_v30, %v66_v34 }
  0x46   :  { %v73_v39 = vadd.f32 %v71_v36, %v67_v35 }
  0x47   :  { %v74_v40 = vadd.f32 %v72_v38, %v68_v37 }
  0x48   :  { %v75_v41 = vmul.f32 %v73_v39, %v37_v0 }
  0x49   :  { %v80_v42 = vadd.f32 %v74_v40, %v73_v39  ;;  %v76_v43 = vmul.f32 %v74_v40, %v38_v1 }
  0x4b   :  { %81 = vadd.xlane.f32.xlu1 %v80_v42  ;;  %v77_v44 = vadd.f32 %v76_v43, %v75_v41 }
  0x4d   :  { %78 = vadd.xlane.f32.xlu0 %v77_v44 }
  0xa4   :  { %v85_v45 = vpop.xlane.xlu0 %84 }
  0xa5   :  { %v90_v46 = vsub.f32 256.0, %v85_v45  ;;  %v87_v47 = vadd.f32 1e-08, %v85_v45 }
  0xa7   :  { %v91_v48 = vadd.f32 1e-08, %v90_v46  ;;  %114 = vrcp.f32 %v87_v47 }
  0xa9   :  { %116 = vrcp.f32 %v91_v48 }
  0xb4   :  { %v115_v50 = vpop.eup %114 }
  0xb6   :  { %v117_v51 = vpop.eup %116 }
  0xd4   :  { %v82_v49 = vpop.xlane.xlu1 %81 }
  0xd6   :  { %v79_v52 = vpop.xlane.xlu0 %78 }
  0xd7   :  { %v86_v53 = vsub.f32 %v82_v49, %v79_v52  ;;  %v89_v54 = vmul.f32 %v115_v50, %v79_v52 }
  0xd9   :  { %v93_v55 = vmul.f32 %v117_v51, %v86_v53 }
  0xdb   :  { %v94_v56 = vadd.f32 %v93_v55, %v89_v54 }
  0xdd   :  { %v95_v57 = vsub.f32 0.0, %v94_v56 }
  0xdf   :  { %97 = vst.msk [vmem:[%s190_s2] sm:$0xff] %vm96_vm0, %v95_v57 }
  0xe0   :  { %102 = vsyncpa [#allocation3], 1 }
  0xe1   :  { %103 = vsyncpa [#allocation5], 1 }

</bundles_post_ra>
